<compile_context>
chip_gen: v7x
topology: tpu7x:2x2x1
jax: 0.10.0
libtpu: 0.0.40
codegen_flags: <defaults>
</compile_context>

<pallas_src>
import jax
import jax.numpy as jnp
from jax import lax
from jax.experimental import pallas as pl
from jax.experimental.pallas import tpu as pltpu

EPS = 1e-5
NEG_SLOPE = 0.2


def _gemm_stats_kernel(p_ref, w_ref, y_ref, stats_ref):
    # LeakyReLU(0.2) on the im2col patches (== LeakyReLU on the zero-padded
    # input, since leaky_relu(0) == 0), then conv-as-GEMM on the MXU with
    # bf16 inputs and f32 accumulation.
    x = p_ref[...].astype(jnp.float32)
    x = jnp.where(x >= 0, x, jnp.float32(NEG_SLOPE) * x)
    y = jnp.dot(x.astype(jnp.bfloat16), w_ref[...],
                preferred_element_type=jnp.float32)
    y_ref[...] = y

    # Per-tile partial statistics (row 0 = sum, row 1 = sum of squares, rest 0).
    # Emitted per tile instead of a serial VMEM accumulator so the m axis stays
    # fully parallel (megacore-friendly on v7x).
    ssum = jnp.sum(y, axis=0, keepdims=True)
    ssq = jnp.sum(y * y, axis=0, keepdims=True)
    pad_rows = jnp.zeros((6, y.shape[1]), jnp.float32)
    stats_ref[...] = jnp.concatenate([ssum, ssq, pad_rows], axis=0)[None]


def _bn_apply_kernel(y_ref, scale_ref, shift_ref, o_ref):
    # One FMA-style VPU pass per tile; scale/shift already fold mean/var/gamma/beta.
    o_ref[...] = y_ref[...] * scale_ref[...] + shift_ref[...]


def _round_up(v, m):
    return (v + m - 1) // m * m


def _pick_tm(m, kpad, cpad, budget_bytes=24 << 20):
    # Largest m-tile (multiple of 8) whose double-buffered tiles fit the budget.
    # Budget chosen conservatively so the same tile also fits v7x (64 MiB VMEM).
    def tile_bytes(tm):
        return (2 * tm * kpad * 2      # bf16 patch tile, double buffered
                + 2 * kpad * cpad * 2  # bf16 weights (resident / double buffered)
                + 2 * tm * cpad * 4    # f32 y output tile, double buffered
                + 2 * 8 * cpad * 4)    # f32 per-tile stats tile
    tm = 8
    for cand in (8, 16, 32, 64, 128, 256, 512, 1024, 2048):
        if cand <= _round_up(m, 8) and tile_bytes(cand) <= budget_bytes:
            tm = cand
    return tm, tile_bytes(tm)


@jax.jit
def block_down(x, w, gamma, beta):
    """x: (N, Cin, H, W) f32; w: (Cout, Cin, 4, 4); gamma/beta: (Cout,)."""
    N, Cin, H, W = x.shape
    Cout = w.shape[0]
    K, S, P = 4, 2, 1
    Ho = (H + 2 * P - K) // S + 1
    Wo = (W + 2 * P - K) // S + 1
    M = N * Ho * Wo
    Kdim = Cin * K * K

    Kpad = _round_up(Kdim, 128)
    Cpad = _round_up(Cout, 128)
    tm, tile_bytes = _pick_tm(M, Kpad, Cpad)
    Mpad = _round_up(M, tm)
    n_tiles = Mpad // tm
    vmem_limit = int(min(max(3 * tile_bytes, 16 << 20), 48 << 20))

    # ---- glue: zero-pad + im2col (layout plumbing), cast to bf16 early to halve
    # the patch HBM traffic into the kernel.
    # TODO(synk): move the patch extraction into the kernel (strided loads from a
    # padded-NHWC HBM ref) to avoid materializing the K*K-expanded patch matrix.
    x_pad = jnp.pad(x, ((0, 0), (0, 0), (P, P), (P, P)))
    cols = []
    for kh in range(K):
        for kw in range(K):
            cols.append(x_pad[:, :, kh:kh + S * Ho:S, kw:kw + S * Wo:S])  # (N,Cin,Ho,Wo)
    patches = jnp.stack(cols, axis=0)            # (K*K, N, Cin, Ho, Wo)
    patches = patches.transpose(1, 3, 4, 2, 0)   # (N, Ho, Wo, Cin, K*K)
    patches = patches.reshape(M, Kdim).astype(jnp.bfloat16)
    patches = jnp.pad(patches, ((0, Mpad - M), (0, Kpad - Kdim)))

    w_mat = w.reshape(Cout, Kdim).T.astype(jnp.bfloat16)   # (Kdim, Cout)
    w_mat = jnp.pad(w_mat, ((0, Kpad - Kdim), (0, Cpad - Cout)))

    # ---- pass 1: LeakyReLU + conv GEMM + per-tile batch statistics.
    y, partials = pl.pallas_call(
        _gemm_stats_kernel,
        out_shape=(jax.ShapeDtypeStruct((Mpad, Cpad), jnp.float32),
                   jax.ShapeDtypeStruct((n_tiles, 8, Cpad), jnp.float32)),
        grid=(n_tiles,),
        in_specs=[
            pl.BlockSpec((tm, Kpad), lambda i: (i, 0)),
            pl.BlockSpec((Kpad, Cpad), lambda i: (0, 0)),
        ],
        out_specs=(
            pl.BlockSpec((tm, Cpad), lambda i: (i, 0)),
            pl.BlockSpec((1, 8, Cpad), lambda i: (i, 0, 0)),
        ),
        compiler_params=pltpu.CompilerParams(
            dimension_semantics=("parallel",),
            vmem_limit_bytes=vmem_limit),
    )(patches, w_mat)

    # ---- tiny per-channel glue: fold batch stats + gamma/beta into scale/shift.
    # Zero-padded rows contribute exactly 0 to both sums, so dividing by the
    # real M keeps the statistics exact (biased variance, BN training mode).
    ssum = jnp.sum(partials[:, 0, :], axis=0)
    ssq = jnp.sum(partials[:, 1, :], axis=0)
    mean = ssum / M
    var = ssq / M - mean * mean
    inv = lax.rsqrt(var + EPS)
    g_pad = jnp.pad(gamma.astype(jnp.float32), (0, Cpad - Cout))
    b_pad = jnp.pad(beta.astype(jnp.float32), (0, Cpad - Cout))
    scale = (g_pad * inv).reshape(1, Cpad)
    shift = (b_pad - mean * g_pad * inv).reshape(1, Cpad)

    # ---- pass 2: mem-bound BN apply, in place over y (input_output_aliases).
    out = pl.pallas_call(
        _bn_apply_kernel,
        out_shape=jax.ShapeDtypeStruct((Mpad, Cpad), jnp.float32),
        grid=(n_tiles,),
        in_specs=[
            pl.BlockSpec((tm, Cpad), lambda i: (i, 0)),
            pl.BlockSpec((1, Cpad), lambda i: (0, 0)),
            pl.BlockSpec((1, Cpad), lambda i: (0, 0)),
        ],
        out_specs=pl.BlockSpec((tm, Cpad), lambda i: (i, 0)),
        input_output_aliases={0: 0},
        compiler_params=pltpu.CompilerParams(
            dimension_semantics=("parallel",),
            vmem_limit_bytes=vmem_limit),
    )(y, scale, shift)

    # (Mpad, Cpad) -> (M, Cout) -> NCHW
    return out[:M, :Cout].reshape(N, Ho, Wo, Cout).transpose(0, 3, 1, 2)


def block_down_reference(x, w, gamma, beta):
    # Pure f32 reference: LeakyReLU -> Conv2d(4, s=2, p=1, no bias) -> BatchNorm2d
    # (training-mode batch stats, biased variance, eps=1e-5, affine).
    a = jnp.where(x >= 0, x, NEG_SLOPE * x)
    y = lax.conv_general_dilated(
        a, w, window_strides=(2, 2), padding=((1, 1), (1, 1)),
        dimension_numbers=("NCHW", "OIHW", "NCHW"))
    mean = y.mean(axis=(0, 2, 3), keepdims=True)
    var = y.var(axis=(0, 2, 3), keepdims=True)
    g = gamma.reshape(1, -1, 1, 1)
    b = beta.reshape(1, -1, 1, 1)
    return (y - mean) * lax.rsqrt(var + EPS) * g + b


if __name__ == "__main__":
    key = jax.random.PRNGKey(0)
    kx, kw = jax.random.split(key)

    N, Cin, Cout, H, W = 2, 4, 8, 16, 16
    x = jax.random.normal(kx, (N, Cin, H, W), dtype=jnp.float32)

    # Deterministic parameter init (shapes per nn.Conv2d / nn.BatchNorm2d).
    fan_in = Cin * 4 * 4
    bound = 1.0 / (fan_in ** 0.5)
    w = jax.random.uniform(kw, (Cout, Cin, 4, 4), jnp.float32, -bound, bound)
    gamma = jnp.ones((Cout,), jnp.float32)   # BatchNorm2d default weight
    beta = jnp.zeros((Cout,), jnp.float32)   # BatchNorm2d default bias

    out = jax.block_until_ready(block_down(x, w, gamma, beta))
    ref = jax.block_until_ready(block_down_reference(x, w, gamma, beta))

    assert out.shape == (N, Cout, H // 2, W // 2), out.shape
    # Tolerance accounts for bf16 MXU inputs (f32 accumulation); BN output is O(1).
    err = float(jnp.abs(out - ref).max())
    assert jnp.allclose(out, ref, atol=2e-2, rtol=2e-2), err
    print("KERNEL_OK")
</pallas_src>

<mosaic_0001>
module attributes {stable_mosaic.version = 11 : i64} {
  func.func @_gemm_stats_kernel(%arg0: i32, %arg1: memref<128x128xbf16, #tpu.memory_space<vmem>>, %arg2: memref<128x128xbf16, #tpu.memory_space<vmem>>, %arg3: memref<128x128xf32, #tpu.memory_space<vmem>>, %arg4: memref<1x8x128xf32, #tpu.memory_space<vmem>>) attributes {dimension_semantics = [#tpu.dimension_semantics<parallel>], iteration_bounds = array<i64: 1>, scalar_prefetch = 0 : i64, scratch_operands = 0 : i64, tpu.core_type = #tpu.core_type<tc>, window_params = [{transform_indices = @transform_0, window_bounds = array<i64: 128, 128>}, {pipeline_mode = #tpu.pipeline_mode<synchronous>, transform_indices = @transform_1, window_bounds = array<i64: 128, 128>}, {transform_indices = @transform_2, window_bounds = array<i64: 128, 128>}, {transform_indices = @transform_3, window_bounds = array<i64: 1, 8, 128>}]} {
    %c0 = arith.constant 0 : index
    %c0_0 = arith.constant 0 : index
    %0 = vector.load %arg1[%c0, %c0_0] : memref<128x128xbf16, #tpu.memory_space<vmem>>, vector<128x128xbf16>
    %1 = arith.extf %0 : vector<128x128xbf16> to vector<128x128xf32>
    %cst = arith.constant 0.000000e+00 : f32
    %2 = vector.broadcast %cst : f32 to vector<128x128xf32>
    %3 = arith.cmpf oge, %1, %2 : vector<128x128xf32>
    %cst_1 = arith.constant 2.000000e-01 : f32
    %4 = vector.broadcast %cst_1 : f32 to vector<128x128xf32>
    %5 = arith.mulf %4, %1 : vector<128x128xf32>
    %6 = arith.select %3, %1, %5 : vector<128x128xi1>, vector<128x128xf32>
    %7 = arith.truncf %6 : vector<128x128xf32> to vector<128x128xbf16>
    %c0_2 = arith.constant 0 : index
    %c0_3 = arith.constant 0 : index
    %8 = vector.load %arg2[%c0_2, %c0_3] : memref<128x128xbf16, #tpu.memory_space<vmem>>, vector<128x128xbf16>
    %cst_4 = arith.constant dense<0.000000e+00> : vector<128x128xf32>
    %9 = tpu.matmul %7, %8, %cst_4 {dimension_numbers = #tpu.dot_dimension_numbers<[1], [0], [0], [1], [0, 0, 1, 1], [], []>} : vector<128x128xbf16>, vector<128x128xbf16>, vector<128x128xf32> -> vector<128x128xf32>
    %c0_5 = arith.constant 0 : index
    %c0_6 = arith.constant 0 : index
    %10 = vector.load %arg3[%c0_5, %c0_6] : memref<128x128xf32, #tpu.memory_space<vmem>>, vector<128x128xf32>
    tpu.vector_store %arg3[%c0_5, %c0_6], %9 {strides = array<i32>} : memref<128x128xf32, #tpu.memory_space<vmem>>, vector<128x128xf32>,
    %cst_7 = arith.constant dense<0.000000e+00> : vector<128xf32>
    %11 = vector.multi_reduction <add>, %9, %cst_7 [0] : vector<128x128xf32> to vector<128xf32>
    %12 = vector.shape_cast %11 : vector<128xf32> to vector<1x128xf32>
    %13 = arith.mulf %9, %9 : vector<128x128xf32>
    %cst_8 = arith.constant dense<0.000000e+00> : vector<128xf32>
    %14 = vector.multi_reduction <add>, %13, %cst_8 [0] : vector<128x128xf32> to vector<128xf32>
    %15 = vector.shape_cast %14 : vector<128xf32> to vector<1x128xf32>
    %cst_9 = arith.constant 0.000000e+00 : f32
    %16 = vector.broadcast %cst_9 : f32 to vector<6x128xf32>
    %17 = tpu.concatenate %12, %15, %16 in 0 : vector<1x128xf32>, vector<1x128xf32>, vector<6x128xf32> -> vector<8x128xf32>
    %18 = vector.shape_cast %17 : vector<8x128xf32> to vector<1x8x128xf32>
    %c0_10 = arith.constant 0 : index
    %c0_11 = arith.constant 0 : index
    %c0_12 = arith.constant 0 : index
    %19 = vector.load %arg4[%c0_10, %c0_11, %c0_12] : memref<1x8x128xf32, #tpu.memory_space<vmem>>, vector<1x8x128xf32>
    tpu.vector_store %arg4[%c0_10, %c0_11, %c0_12], %18 {strides = array<i32>} : memref<1x8x128xf32, #tpu.memory_space<vmem>>, vector<1x8x128xf32>,
    return
  }
  func.func @transform_0(%arg0: i32) -> (i32, i32) {
    %c0_i32 = arith.constant 0 : i32
    %c0_i32_0 = arith.constant 0 : i32
    return %arg0, %c0_i32 : i32, i32
  }
  func.func @transform_1(%arg0: i32) -> (i32, i32) {
    %c0_i32 = arith.constant 0 : i32
    %c0_i32_0 = arith.constant 0 : i32
    %c0_i32_1 = arith.constant 0 : i32
    return %c0_i32, %c0_i32_0 : i32, i32
  }
  func.func @transform_2(%arg0: i32) -> (i32, i32) {
    %c0_i32 = arith.constant 0 : i32
    %c0_i32_0 = arith.constant 0 : i32
    return %arg0, %c0_i32 : i32, i32
  }
  func.func @transform_3(%arg0: i32) -> (i32, i32, i32) {
    %c0_i32 = arith.constant 0 : i32
    %c0_i32_0 = arith.constant 0 : i32
    %c0_i32_1 = arith.constant 0 : i32
    return %arg0, %c0_i32, %c0_i32_0 : i32, i32, i32
  }
}

module attributes {stable_mosaic.version = 11 : i64} {
  func.func @_bn_apply_kernel(%arg0: i32, %arg1: memref<128x128xf32, #tpu.memory_space<vmem>>, %arg2: memref<1x128xf32, #tpu.memory_space<vmem>>, %arg3: memref<1x128xf32, #tpu.memory_space<vmem>>, %arg4: memref<128x128xf32, #tpu.memory_space<vmem>>) attributes {dimension_semantics = [#tpu.dimension_semantics<parallel>], iteration_bounds = array<i64: 1>, scalar_prefetch = 0 : i64, scratch_operands = 0 : i64, tpu.core_type = #tpu.core_type<tc>, window_params = [{transform_indices = @transform_0, window_bounds = array<i64: 128, 128>}, {pipeline_mode = #tpu.pipeline_mode<synchronous>, transform_indices = @transform_1, window_bounds = array<i64: 1, 128>}, {pipeline_mode = #tpu.pipeline_mode<synchronous>, transform_indices = @transform_2, window_bounds = array<i64: 1, 128>}, {transform_indices = @transform_3, window_bounds = array<i64: 128, 128>}]} {
    %c0 = arith.constant 0 : index
    %c0_0 = arith.constant 0 : index
    %0 = vector.load %arg1[%c0, %c0_0] : memref<128x128xf32, #tpu.memory_space<vmem>>, vector<128x128xf32>
    %c0_1 = arith.constant 0 : index
    %c0_2 = arith.constant 0 : index
    %1 = vector.load %arg2[%c0_1, %c0_2] : memref<1x128xf32, #tpu.memory_space<vmem>>, vector<1x128xf32>
    %2 = vector.broadcast %1 : vector<1x128xf32> to vector<128x128xf32>
    %3 = arith.mulf %0, %2 : vector<128x128xf32>
    %c0_3 = arith.constant 0 : index
    %c0_4 = arith.constant 0 : index
    %4 = vector.load %arg3[%c0_3, %c0_4] : memref<1x128xf32, #tpu.memory_space<vmem>>, vector<1x128xf32>
    %5 = vector.broadcast %4 : vector<1x128xf32> to vector<128x128xf32>
    %6 = arith.addf %3, %5 : vector<128x128xf32>
    %c0_5 = arith.constant 0 : index
    %c0_6 = arith.constant 0 : index
    %7 = vector.load %arg4[%c0_5, %c0_6] : memref<128x128xf32, #tpu.memory_space<vmem>>, vector<128x128xf32>
    tpu.vector_store %arg4[%c0_5, %c0_6], %6 {strides = array<i32>} : memref<128x128xf32, #tpu.memory_space<vmem>>, vector<128x128xf32>,
    return
  }
  func.func @transform_0(%arg0: i32) -> (i32, i32) {
    %c0_i32 = arith.constant 0 : i32
    %c0_i32_0 = arith.constant 0 : i32
    return %arg0, %c0_i32 : i32, i32
  }
  func.func @transform_1(%arg0: i32) -> (i32, i32) {
    %c0_i32 = arith.constant 0 : i32
    %c0_i32_0 = arith.constant 0 : i32
    %c0_i32_1 = arith.constant 0 : i32
    return %c0_i32, %c0_i32_0 : i32, i32
  }
  func.func @transform_2(%arg0: i32) -> (i32, i32) {
    %c0_i32 = arith.constant 0 : i32
    %c0_i32_0 = arith.constant 0 : i32
    %c0_i32_1 = arith.constant 0 : i32
    return %c0_i32, %c0_i32_0 : i32, i32
  }
  func.func @transform_3(%arg0: i32) -> (i32, i32) {
    %c0_i32 = arith.constant 0 : i32
    %c0_i32_0 = arith.constant 0 : i32
    return %arg0, %c0_i32 : i32, i32
  }
}

</mosaic_0001>

<bundles_post_ra>
// kernel: block_down.3
= control target key start
LH: loop header
LB: loop body
LE: loop exit
PB: predicated region body
PF: predicated region fallthrough
CT: control target
= control target key end

     0   :  { %s220_s0 = inlined_call_operand.vmem [shape: f32[128,128], index: 0, kind: input, shape index: {}, may-alias: {0,3}]   ;;  %s221_s1 = inlined_call_operand.vmem [shape: f32[1,128], index: 1, kind: input, shape index: {}]   ;;  %s222_s2 = inlined_call_operand.vmem [shape: f32[1,128], index: 2, kind: input, shape index: {}]   ;;  %s223_s3 = inlined_call_operand.vmem [shape: f32[128,128], index: 3, kind: output, shape index: {}, may-alias: {0,3}]  }
   0x1   :  { %v14_v0 = vld [vmem:[%s220_s0] sm:$0xff]  ;;  %v15_v4 = vld [vmem:[%s220_s0 + $0x8] sm:$0xff]  ;;  %v16_v5 = vld [vmem:[%s220_s0 + $0x10] sm:$0xff] }
   0x2   :  { %v96_v1 = vld [vmem:[%s221_s1] ss:$0 sm:$0xff]  ;;  %v17_v6 = vld [vmem:[%s220_s0 + $0x18] sm:$0xff]  ;;  %v19_v11 = vld [vmem:[%s220_s0 + $0x28] sm:$0xff] }
   0x3   :  { %v97_v2 = vld [vmem:[%s222_s2] ss:$0 sm:$0xff]  ;;  %v37_v3 = vmul.f32 %v96_v1, %v14_v0  ;;  %v38_v7 = vmul.f32 %v96_v1, %v15_v4  ;;  %v39_v8 = vmul.f32 %v96_v1, %v16_v5  ;;  %v40_v9 = vmul.f32 %v96_v1, %v17_v6  ;;  %v20_v12 = vld [vmem:[%s220_s0 + $0x30] sm:$0xff]  ;;  %v21_v17 = vld [vmem:[%s220_s0 + $0x38] sm:$0xff] }
   0x4   :  { %v18_v10 = vld [vmem:[%s220_s0 + $0x20] sm:$0xff]  ;;  %v42_v15 = vmul.f32 %v96_v1, %v19_v11  ;;  %v43_v16 = vmul.f32 %v96_v1, %v20_v12  ;;  %v23_v19 = vld [vmem:[%s220_s0 + $0x48] sm:$0xff]  ;;  %v44_v23 = vmul.f32 %v96_v1, %v21_v17  ;;  %v24_v24 = vld [vmem:[%s220_s0 + $0x50] sm:$0xff] }
   0x5   :  { %v60_v13 = vadd.f32 %v97_v2, %v37_v3  ;;  %v41_v14 = vmul.f32 %v96_v1, %v18_v10  ;;  %v22_v18 = vld [vmem:[%s220_s0 + $0x40] sm:$0xff]  ;;  %v61_v20 = vadd.f32 %v97_v2, %v38_v7  ;;  %v62_v21 = vadd.f32 %v97_v2, %v39_v8  ;;  %v25_v25 = vld [vmem:[%s220_s0 + $0x58] sm:$0xff] }
   0x6   :  { %v63_v22 = vadd.f32 %v97_v2, %v40_v9  ;;  %v26_v26 = vld [vmem:[%s220_s0 + $0x60] sm:$0xff]  ;;  %v65_v28 = vadd.f32 %v97_v2, %v42_v15  ;;  %v66_v29 = vadd.f32 %v97_v2, %v43_v16  ;;  %v45_v30 = vmul.f32 %v96_v1, %v22_v18 }
   0x7   :  { %76 = vst [vmem:[%s223_s3] sm:$0xff] %v60_v13  ;;  %v64_v27 = vadd.f32 %v97_v2, %v41_v14  ;;  %v67_v34 = vadd.f32 %v97_v2, %v44_v23  ;;  %v46_v35 = vmul.f32 %v96_v1, %v23_v19  ;;  %v47_v36 = vmul.f32 %v96_v1, %v24_v24 }
   0x8   :  { %v48_v37 = vmul.f32 %v96_v1, %v25_v25  ;;  %v68_v38 = vadd.f32 %v97_v2, %v45_v30  ;;  %v49_v39 = vmul.f32 %v96_v1, %v26_v26 }
   0x9   :  { %v69_v42 = vadd.f32 %v97_v2, %v46_v35  ;;  %v70_v43 = vadd.f32 %v97_v2, %v47_v36 }
   0xa   :  { %v71_v44 = vadd.f32 %v97_v2, %v48_v37  ;;  %v72_v46 = vadd.f32 %v97_v2, %v49_v39 }
   0xe   :  { %v27_v31 = vld [vmem:[%s220_s0 + $0x68] sm:$0xff]  ;;  %v28_v32 = vld [vmem:[%s220_s0 + $0x70] sm:$0xff]  ;;  %v29_v33 = vld [vmem:[%s220_s0 + $0x78] sm:$0xff] }
   0xf   :  { %77 = vst [vmem:[%s223_s3 + $0x8] sm:$0xff] %v61_v20  ;;  %78 = vst [vmem:[%s223_s3 + $0x10] sm:$0xff] %v62_v21  ;;  %v50_v40 = vmul.f32 %v96_v1, %v27_v31  ;;  %v51_v41 = vmul.f32 %v96_v1, %v28_v32  ;;  %v52_v45 = vmul.f32 %v96_v1, %v29_v33 }
  0x10   :  { %79 = vst [vmem:[%s223_s3 + $0x18] sm:$0xff] %v63_v22  ;;  %80 = vst [vmem:[%s223_s3 + $0x20] sm:$0xff] %v64_v27 }
  0x11   :  { %81 = vst [vmem:[%s223_s3 + $0x28] sm:$0xff] %v65_v28  ;;  %82 = vst [vmem:[%s223_s3 + $0x30] sm:$0xff] %v66_v29  ;;  %v73_v47 = vadd.f32 %v97_v2, %v50_v40  ;;  %v74_v48 = vadd.f32 %v97_v2, %v51_v41  ;;  %v75_v49 = vadd.f32 %v97_v2, %v52_v45 }
  0x12   :  { %83 = vst [vmem:[%s223_s3 + $0x38] sm:$0xff] %v67_v34  ;;  %84 = vst [vmem:[%s223_s3 + $0x40] sm:$0xff] %v68_v38 }
  0x13   :  { %85 = vst [vmem:[%s223_s3 + $0x48] sm:$0xff] %v69_v42  ;;  %86 = vst [vmem:[%s223_s3 + $0x50] sm:$0xff] %v70_v43 }
  0x14   :  { %87 = vst [vmem:[%s223_s3 + $0x58] sm:$0xff] %v71_v44  ;;  %88 = vst [vmem:[%s223_s3 + $0x60] sm:$0xff] %v72_v46 }
  0x15   :  { %89 = vst [vmem:[%s223_s3 + $0x68] sm:$0xff] %v73_v47  ;;  %90 = vst [vmem:[%s223_s3 + $0x70] sm:$0xff] %v74_v48 }
  0x16   :  { %91 = vst [vmem:[%s223_s3 + $0x78] sm:$0xff] %v75_v49 }

// kernel: block_down.2
= control target key start
LH: loop header
LB: loop body
LE: loop exit
PB: predicated region body
PF: predicated region fallthrough
CT: control target
= control target key end

     0   :  { %s593_s1 = inlined_call_operand.vmem [shape: bf16[128,128], index: 1, kind: input, shape index: {}]   ;;  %s594_s0 = inlined_call_operand.vmem [shape: bf16[128,128], index: 0, kind: input, shape index: {}]   ;;  %s595_s2 = inlined_call_operand.vmem [shape: f32[128,128], index: 2, kind: output, shape index: {0}]   ;;  %s596_s3 = inlined_call_operand.vmem [shape: f32[1,8,128], index: 3, kind: output, shape index: {1}]  }
   0x1   :  { %v461_v0 = vld [vmem:[%s593_s1] sm:$0xff]   ;;  %v462_v1 = vld [vmem:[%s593_s1 + $0x8] sm:$0xff]   ;;  %v463_v2 = vld [vmem:[%s593_s1 + $0x10] sm:$0xff]  }
   0x2   :  { %413 = vmatprep.subr.bf16.mxu0 %v461_v0  ;;  %445 = vmatprep.subr.bf16.mxu1 %v461_v0  ;;  %v464_v3 = vld [vmem:[%s593_s1 + $0x18] sm:$0xff]   ;;  %v359_v4 = vld [vmem:[%s594_s0] sm:$0xff]   ;;  %v390_v12 = vld [vmem:[%s594_s0 + $0x8] sm:$0xff]  }
   0x3   :  { %414 = vmatpush3.bf16.msra.mxu0 %v461_v0  ;;  %453 = vmatpush3.bf16.msra.mxu1 %v461_v0  ;;  %v360_v5 = vunpack.c.l.bf16 %v359_v4  ;;  %v361_v6 = vunpack.c.h.bf16 %v359_v4  ;;  %v465_v9 = vld [vmem:[%s593_s1 + $0x20] sm:$0xff]   ;;  %v391_v15 = vld [vmem:[%s594_s0 + $0x10] sm:$0xff]   ;;  %v394_v16 = vld [vmem:[%s594_s0 + $0x28] sm:$0xff]   ;;  %v364_v18 = vunpack.c.l.bf16 %v390_v12  ;;  %v365_v19 = vunpack.c.h.bf16 %v390_v12 }
   0x4   :  { %415 = vmatprep.subr.bf16.mxu0 %v462_v1  ;;  %446 = vmatprep.subr.bf16.mxu1 %v462_v1  ;;  %v393_v13 = vld [vmem:[%s594_s0 + $0x20] sm:$0xff]   ;;  %v466_v17 = vld [vmem:[%s593_s1 + $0x28] sm:$0xff]   ;;  %v368_v22 = vunpack.c.l.bf16 %v391_v15  ;;  %v369_v23 = vunpack.c.h.bf16 %v391_v15  ;;  %v380_v24 = vunpack.c.l.bf16 %v394_v16  ;;  %v395_v25 = vld [vmem:[%s594_s0 + $0x30] sm:$0xff]   ;;  %v381_v28 = vunpack.c.h.bf16 %v394_v16 }
   0x5   :  { %vm46_vm0 = vcmp.ge.f32.partialorder %v360_v5, 0.0  ;;  %vm47_vm1 = vcmp.ge.f32.partialorder %v361_v6, 0.0  ;;  %v62_v7 = vmul.f32 0.2, %v360_v5  ;;  %v63_v8 = vmul.f32 0.2, %v361_v6 }
   0x6   :  { %v376_v20 = vunpack.c.l.bf16 %v393_v13  ;;  %v377_v21 = vunpack.c.h.bf16 %v393_v13  ;;  %v467_v29 = vld [vmem:[%s593_s1 + $0x30] sm:$0xff]   ;;  %vm48_vm4 = vcmp.ge.f32.partialorder %v364_v18, 0.0  ;;  %vm49_vm5 = vcmp.ge.f32.partialorder %v365_v19, 0.0  ;;  %v392_v31 = vld [vmem:[%s594_s0 + $0x18] sm:$0xff]  }
   0x7   :  { %416 = vmatpush3.bf16.msra.mxu0 %v462_v1  ;;  %454 = vmatpush3.bf16.msra.mxu1 %v462_v1  ;;  %v78_v10 = vsel %vm46_vm0, %v360_v5, %v62_v7  ;;  %v79_v11 = vsel %vm47_vm1, %v361_v6, %v63_v8  ;;  %v64_v30 = vmul.f32 0.2, %v364_v18  ;;  %v384_v34 = vunpack.c.l.bf16 %v395_v25  ;;  %v468_v36 = vld [vmem:[%s593_s1 + $0x38] sm:$0xff]  }
   0x8   :  { %417 = vmatprep.subr.bf16.mxu0 %v463_v2  ;;  %447 = vmatprep.subr.bf16.mxu1 %v463_v2  ;;  %v94_v14 = vpack.c.bf16 %v79_v11, %v78_v10  ;;  %vm54_vm2 = vcmp.ge.f32.partialorder %v376_v20, 0.0  ;;  %vm55_vm3 = vcmp.ge.f32.partialorder %v377_v21, 0.0  ;;  %v70_v26 = vmul.f32 0.2, %v376_v20  ;;  %v396_v40 = vld [vmem:[%s594_s0 + $0x38] sm:$0xff]  }
   0x9   :  { %v71_v27 = vmul.f32 0.2, %v377_v21  ;;  %v385_v35 = vunpack.c.h.bf16 %v395_v25  ;;  %v65_v37 = vmul.f32 0.2, %v365_v19  ;;  %vm50_vm6 = vcmp.ge.f32.partialorder %v368_v22, 0.0 }
   0xa   :  { %429 = vmatprep.mubr.bf16.mxu0 %v94_v14  ;;  %v86_v32 = vsel %vm54_vm2, %v376_v20, %v70_v26  ;;  %v66_v38 = vmul.f32 0.2, %v368_v22  ;;  %v67_v41 = vmul.f32 0.2, %v369_v23  ;;  %v72_v42 = vmul.f32 0.2, %v380_v24 }
   0xb   :  { %418 = vmatpush3.bf16.msra.mxu0 %v463_v2  ;;  %455 = vmatpush3.bf16.msra.mxu1 %v463_v2  ;;  %v87_v33 = vsel %vm55_vm3, %v377_v21, %v71_v27  ;;  %v73_v43 = vmul.f32 0.2, %v381_v28  ;;  %vm56_vm7 = vcmp.ge.f32.partialorder %v380_v24, 0.0  ;;  %vm57_vm8 = vcmp.ge.f32.partialorder %v381_v28, 0.0 }
   0xc   :  { %419 = vmatprep.subr.bf16.mxu0 %v464_v3  ;;  %448 = vmatprep.subr.bf16.mxu1 %v464_v3  ;;  %v98_v39 = vpack.c.bf16 %v87_v33, %v86_v32  ;;  %v74_v44 = vmul.f32 0.2, %v384_v34  ;;  %v75_v45 = vmul.f32 0.2, %v385_v35  ;;  %vm51_vm9 = vcmp.ge.f32.partialorder %v369_v23, 0.0 }
   0xd   :  { %v372_v46 = vunpack.c.l.bf16 %v392_v31  ;;  %vm58_vm10 = vcmp.ge.f32.partialorder %v384_v34, 0.0  ;;  %vm59_vm11 = vcmp.ge.f32.partialorder %v385_v35, 0.0  ;;  %v80_v47 = vsel %vm48_vm4, %v364_v18, %v64_v30 }
   0xe   :  { %437 = vmatprep.mubr.bf16.mxu1 %v98_v39  ;;  %v81_v48 = vsel %vm49_vm5, %v365_v19, %v65_v37  ;;  %v82_v49 = vsel %vm50_vm6, %v368_v22, %v66_v38  ;;  %v373_v50 = vunpack.c.h.bf16 %v392_v31  ;;  %v88_v51 = vsel %vm56_vm7, %v380_v24, %v72_v42 }
   0xf   :  { %420 = vmatpush3.bf16.msra.mxu0 %v464_v3  ;;  %456 = vmatpush3.bf16.msra.mxu1 %v464_v3  ;;  %v89_v52 = vsel %vm57_vm8, %v381_v28, %v73_v43  ;;  %v388_v53 = vunpack.c.l.bf16 %v396_v40  ;;  %v389_v54 = vunpack.c.h.bf16 %v396_v40  ;;  %v83_v55 = vsel %vm51_vm9, %v369_v23, %v67_v41 }
  0x10   :  { %421 = vmatprep.subr.bf16.mxu0 %v465_v9  ;;  %449 = vmatprep.subr.bf16.mxu1 %v465_v9  ;;  %v90_v56 = vsel %vm58_vm10, %v384_v34, %v74_v44  ;;  %v91_v57 = vsel %vm59_vm11, %v385_v35, %v75_v45  ;;  %v95_v58 = vpack.c.bf16 %v81_v48, %v80_v47  ;;  %vm52_vm12 = vcmp.ge.f32.partialorder %v372_v46, 0.0 }
  0x11   :  { %v68_v59 = vmul.f32 0.2, %v372_v46  ;;  %v69_v60 = vmul.f32 0.2, %v373_v50  ;;  %v99_v61 = vpack.c.bf16 %v89_v52, %v88_v51  ;;  %v96_v62 = vpack.c.bf16 %v83_v55, %v82_v49 }
  0x12   :  { %v100_v63 = vpack.c.bf16 %v91_v57, %v90_v56  ;;  %v76_v0 = vmul.f32 0.2, %v388_v53  ;;  %v77_v1 = vmul.f32 0.2, %v389_v54  ;;  %vm53_vm13 = vcmp.ge.f32.partialorder %v373_v50, 0.0 }
  0x13   :  { %422 = vmatpush3.bf16.msra.mxu0 %v465_v9  ;;  %457 = vmatpush3.bf16.msra.mxu1 %v465_v9  ;;  %vm60_vm14 = vcmp.ge.f32.partialorder %v388_v53, 0.0  ;;  %vm61_vm15 = vcmp.ge.f32.partialorder %v389_v54, 0.0  ;;  %v84_v2 = vsel %vm52_vm12, %v372_v46, %v68_v59  ;;  %v85_v3 = vsel %vm53_vm13, %v373_v50, %v69_v60 }
  0x14   :  { %423 = vmatprep.subr.bf16.mxu0 %v466_v17  ;;  %450 = vmatprep.subr.bf16.mxu1 %v466_v17  ;;  %v92_v4 = vsel %vm60_vm14, %v388_v53, %v76_v0  ;;  %v93_v5 = vsel %vm61_vm15, %v389_v54, %v77_v1  ;;  %v97_v6 = vpack.c.bf16 %v85_v3, %v84_v2  ;;  %vm337_vm0 = vcmask 1040384  }
  0x15   :  { %v101_v7 = vpack.c.bf16 %v93_v5, %v92_v4  ;;  %vm339_vm1 = vcmask 1041408  }
  0x17   :  { %424 = vmatpush3.bf16.msra.mxu0 %v466_v17  ;;  %458 = vmatpush3.bf16.msra.mxu1 %v466_v17 }
  0x18   :  { %425 = vmatprep.subr.bf16.mxu0 %v467_v29  ;;  %451 = vmatprep.subr.bf16.mxu1 %v467_v29 }
  0x1b   :  { %426 = vmatpush3.bf16.msra.mxu0 %v467_v29  ;;  %459 = vmatpush3.bf16.msra.mxu1 %v467_v29 }
  0x1c   :  { %427 = vmatprep.subr.bf16.mxu0 %v468_v36  ;;  %452 = vmatprep.subr.bf16.mxu1 %v468_v36 }
  0x1f   :  { %428 = vmatpush3.bf16.msra.mxu0 %v468_v36  ;;  %460 = vmatpush3.bf16.msra.mxu1 %v468_v36 }
  0x22   :  { %430 = vmatmul.mubr.bf16.vlgmr.msra.gmra.mrb[0].mxu0 %v95_v58  ;;  %438 = vmatmul.mubr.bf16.vlgmr.msra.gmra.mrb[0].mxu1 %v99_v61 }
  0x23   :  { %433 = vmatprep.mubr.bf16.mxu0 %v96_v62  ;;  %441 = vmatprep.mubr.bf16.mxu1 %v100_v63 }
  0x2a   :  { %434 = vmatmul.mubr.bf16.gmra.mrb[4].mxu0 %v97_v6  ;;  %442 = vmatmul.mubr.bf16.gmra.mrb[4].mxu1 %v101_v7 }
  0xf5   :  { %v431_v8 = vpop.f32.mrb[0].mxu0  ;;  %v439_v9 = vpop.f32.mrb[0].mxu1 }
  0xf6   :  { %265 = vst [vmem:[%s595_s2 + $0x10] sm:$0xff] %v431_v8  ;;  %v200_v10 = vpop.f32.mrb[1].mxu0  ;;  %273 = vst [vmem:[%s595_s2 + $0x50] sm:$0xff] %v439_v9  ;;  %v232_v11 = vpop.f32.mrb[1].mxu1  ;;  %v302_v19 = vmul.f32 %v431_v8, %v431_v8  ;;  %v310_v51 = vmul.f32 %v439_v9, %v439_v9 }
  0xf7   :  { %263 = vst [vmem:[%s595_s2] sm:$0xff] %v200_v10  ;;  %v432_v12 = vpop.f32.mrb[2].mxu0  ;;  %271 = vst [vmem:[%s595_s2 + $0x40] sm:$0xff] %v232_v11  ;;  %v440_v13 = vpop.f32.mrb[2].mxu1  ;;  %v300_v16 = vmul.f32 %v200_v10, %v200_v10  ;;  %v308_v45 = vmul.f32 %v232_v11, %v232_v11 }
  0xf8   :  { %266 = vst [vmem:[%s595_s2 + $0x18] sm:$0xff] %v432_v12  ;;  %v203_v14 = vpop.f32.mrb[3].mxu0  ;;  %274 = vst [vmem:[%s595_s2 + $0x58] sm:$0xff] %v440_v13  ;;  %v235_v15 = vpop.f32.mrb[3].mxu1  ;;  %v303_v22 = vmul.f32 %v432_v12, %v432_v12  ;;  %v311_v54 = vmul.f32 %v440_v13, %v440_v13 }
  0xf9   :  { %264 = vst [vmem:[%s595_s2 + $0x8] sm:$0xff] %v203_v14  ;;  %v279_v17 = vadd.f32 %v203_v14, %v200_v10  ;;  %v301_v18 = vmul.f32 %v203_v14, %v203_v14  ;;  %272 = vst [vmem:[%s595_s2 + $0x48] sm:$0xff] %v235_v15  ;;  %v309_v50 = vmul.f32 %v235_v15, %v235_v15 }
  0xfb   :  { %v280_v20 = vadd.f32 %v431_v8, %v279_v17  ;;  %v316_v21 = vadd.f32 %v301_v18, %v300_v16 }
  0xfd   :  { %v317_v23 = vadd.f32 %v316_v21, %v302_v19  ;;  %v435_v24 = vpop.f32.mrb[4].mxu0  ;;  %v281_v25 = vadd.f32 %v432_v12, %v280_v20  ;;  %v443_v26 = vpop.f32.mrb[4].mxu1 }
  0xfe   :  { %269 = vst [vmem:[%s595_s2 + $0x30] sm:$0xff] %v435_v24  ;;  %v216_v27 = vpop.f32.mrb[5].mxu0  ;;  %277 = vst [vmem:[%s595_s2 + $0x70] sm:$0xff] %v443_v26  ;;  %v248_v28 = vpop.f32.mrb[5].mxu1  ;;  %v306_v39 = vmul.f32 %v435_v24, %v435_v24  ;;  %v314_v63 = vmul.f32 %v443_v26, %v443_v26 }
  0xff   :  { %267 = vst [vmem:[%s595_s2 + $0x20] sm:$0xff] %v216_v27  ;;  %v282_v29 = vadd.f32 %v281_v25, %v216_v27  ;;  %v304_v30 = vmul.f32 %v216_v27, %v216_v27  ;;  %v318_v31 = vadd.f32 %v317_v23, %v303_v22  ;;  %v436_v32 = vpop.f32.mrb[6].mxu0  ;;  %275 = vst [vmem:[%s595_s2 + $0x60] sm:$0xff] %v248_v28  ;;  %v444_v33 = vpop.f32.mrb[6].mxu1 }
 0x100   :  { %270 = vst [vmem:[%s595_s2 + $0x38] sm:$0xff] %v436_v32  ;;  %v219_v34 = vpop.f32.mrb[7].mxu0  ;;  %278 = vst [vmem:[%s595_s2 + $0x78] sm:$0xff] %v444_v33  ;;  %v251_v35 = vpop.f32.mrb[7].mxu1  ;;  %v307_v42 = vmul.f32 %v436_v32, %v436_v32  ;;  %v312_v57 = vmul.f32 %v248_v28, %v248_v28  ;;  %v315_v2 = vmul.f32 %v444_v33, %v444_v33 }
 0x101   :  { %v319_v36 = vadd.f32 %v318_v31, %v304_v30  ;;  %268 = vst [vmem:[%s595_s2 + $0x28] sm:$0xff] %v219_v34  ;;  %v283_v37 = vadd.f32 %v282_v29, %v219_v34  ;;  %v305_v38 = vmul.f32 %v219_v34, %v219_v34  ;;  %276 = vst [vmem:[%s595_s2 + $0x68] sm:$0xff] %v251_v35 }
 0x102   :  { %v313_v62 = vmul.f32 %v251_v35, %v251_v35 }
 0x103   :  { %v284_v40 = vadd.f32 %v435_v24, %v283_v37  ;;  %v320_v41 = vadd.f32 %v319_v36, %v305_v38 }
 0x105   :  { %v321_v43 = vadd.f32 %v320_v41, %v306_v39  ;;  %v285_v44 = vadd.f32 %v436_v32, %v284_v40 }
 0x107   :  { %v286_v46 = vadd.f32 %v285_v44, %v232_v11  ;;  %v322_v47 = vadd.f32 %v321_v43, %v307_v42 }
 0x109   :  { %v323_v48 = vadd.f32 %v322_v47, %v308_v45  ;;  %v287_v49 = vadd.f32 %v286_v46, %v235_v15 }
 0x10b   :  { %v288_v52 = vadd.f32 %v439_v9, %v287_v49  ;;  %v324_v53 = vadd.f32 %v323_v48, %v309_v50 }
 0x10d   :  { %v325_v55 = vadd.f32 %v324_v53, %v310_v51  ;;  %v289_v56 = vadd.f32 %v440_v13, %v288_v52 }
 0x10f   :  { %v290_v58 = vadd.f32 %v289_v56, %v248_v28  ;;  %v326_v59 = vadd.f32 %v325_v55, %v311_v54 }
 0x111   :  { %v327_v60 = vadd.f32 %v326_v59, %v312_v57  ;;  %v291_v61 = vadd.f32 %v290_v58, %v251_v35 }
 0x113   :  { %v292_v0 = vadd.f32 %v443_v26, %v291_v61  ;;  %v328_v1 = vadd.f32 %v327_v60, %v313_v62 }
 0x115   :  { %v293_v3 = vadd.f32 %v444_v33, %v292_v0  ;;  %v329_v4 = vadd.f32 %v328_v1, %v314_v63 }
 0x117   :  { %v294_v5 = vrot.slane %v293_v3, 4  ;;  %v330_v6 = vadd.f32 %v329_v4, %v315_v2 }
 0x119   :  { %v295_v7 = vadd.f32 %v294_v5, %v293_v3  ;;  %v331_v8 = vrot.slane %v330_v6, 4 }
 0x11b   :  { %v296_v9 = vrot.slane %v295_v7, 2  ;;  %v332_v10 = vadd.f32 %v331_v8, %v330_v6 }
 0x11d   :  { %v297_v11 = vadd.f32 %v296_v9, %v295_v7  ;;  %v333_v12 = vrot.slane %v332_v10, 2 }
 0x11f   :  { %v298_v13 = vrot.slane %v297_v11, 1  ;;  %v334_v14 = vadd.f32 %v333_v12, %v332_v10 }
 0x121   :  { %v335_v15 = vrot.slane %v334_v14, 1  ;;  %v299_v16 = vadd.f32 %v298_v13, %v297_v11 }
 0x123   :  { %v336_v17 = vadd.f32 %v335_v15, %v334_v14 }
 0x125   :  { %v338_v18 = vsel %vm337_vm0, %v299_v16, %v336_v17 }
 0x126   :  { %v340_v19 = vsel %vm339_vm1, %v338_v18, 0.0 }
 0x127   :  { %341 = vst [vmem:[%s596_s3] sm:$0xff] %v340_v19 }

</bundles_post_ra>
